<compile_context>
chip_gen: v7x
topology: tpu7x:2x2x1
jax: 0.10.0
libtpu: 0.0.40
codegen_flags: <defaults>
</compile_context>

<pallas_src>
import functools

import jax
import jax.numpy as jnp
from jax.experimental import pallas as pl
from jax.experimental.pallas import tpu as pltpu

# ----------------------------- model config ---------------------------------
INPUT_SIZE = 10    # attention_classiffier default input_size
N_CLASSES = 3      # attention_classiffier default n_classes
C_PAD = 128        # lane-pad the FC output dim (sliced back to N_CLASSES)
NEG_INF = -1e10    # masking constant used by the reference


def _round_up(n, m):
    return ((n + m - 1) // m) * m


# ----------------------------- Pallas kernel ---------------------------------
def _attn_cls_kernel(x_ref, wa_ref, ba_ref, cv_ref, wfc_ref, bfc_ref, o_ref):
    """One (Bt, T, D) batch tile per grid step; everything resident in VMEM."""
    bt, t, d = x_ref.shape
    x = x_ref[...]                                            # (Bt, T, D) f32

    # attention_net: Linear(D, D) on the folded (Bt*T, D) token slab.
    # bf16 MXU operands (weights pre-cast), f32 accumulation.
    a = jnp.dot(x.reshape(bt * t, d).astype(jnp.bfloat16), wa_ref[...],
                preferred_element_type=jnp.float32) + ba_ref[...]
    a = jnp.tanh(a).reshape(bt, t, d)                         # f32 (EUP)

    # similarity with the single-head context vector -> (Bt, T, 1)
    sim = jnp.sum(a * cv_ref[...], axis=-1, keepdims=True)

    # mask padding rows: similarity[x.sum(-1) == 0] = -1e10
    is_pad = jnp.sum(x, axis=-1, keepdims=True) == 0.0
    sim = jnp.where(is_pad, NEG_INF, sim)

    # numerically-stable softmax over the sequence axis (axis 1), f32
    m = jnp.max(sim, axis=1, keepdims=True)
    p = jnp.exp(sim - m)
    w = p * pl.reciprocal(jnp.sum(p, axis=1, keepdims=True), approx=False)

    # weighted token sum -> (Bt, D), then ReLU
    summary = jnp.maximum(jnp.sum(w * x, axis=1), 0.0)

    # FC head (output lane-padded to 128; wrapper slices back to n_classes)
    o_ref[...] = jnp.dot(summary.astype(jnp.bfloat16), wfc_ref[...],
                         preferred_element_type=jnp.float32) + bfc_ref[...]


@functools.partial(jax.jit, static_argnames=("block_batch",))
def attention_classifier_forward(params, fng_rh, rh_length=None, *,
                                 block_batch=1024):
    """fng_rh: (B, T, INPUT_SIZE) f32 -> logits (B, N_CLASSES).

    rh_length is accepted for signature parity with the PyTorch module but the
    reference forward never reads it (padding is detected via x.sum(-1) == 0).
    """
    del rh_length
    B, T, D = fng_rh.shape

    # Batch-tile size: multiple of 8 (sublane-aligned output blocks), capped so
    # the lane-padded, double-buffered input block stays comfortably inside the
    # 32 MiB scoped VMEM limit on every TPU generation (incl. v7x's 64 MiB).
    bt = min(block_batch, _round_up(B, 8))
    b_pad = _round_up(B, bt)
    if b_pad != B:
        fng_rh = jnp.pad(fng_rh, ((0, b_pad - B), (0, 0), (0, 0)))

    out = pl.pallas_call(
        _attn_cls_kernel,
        out_shape=jax.ShapeDtypeStruct((b_pad, C_PAD), jnp.float32),
        grid=(b_pad // bt,),
        in_specs=[
            pl.BlockSpec((bt, T, D), lambda i: (i, 0, 0)),   # batch tile of activations
            pl.BlockSpec((D, D), lambda i: (0, 0)),          # attention_net W (in,out) bf16
            pl.BlockSpec((1, D), lambda i: (0, 0)),          # attention_net bias f32
            pl.BlockSpec((1, D), lambda i: (0, 0)),          # context vector (1 head) f32
            pl.BlockSpec((D, C_PAD), lambda i: (0, 0)),      # FC W (in,out) lane-padded bf16
            pl.BlockSpec((1, C_PAD), lambda i: (0, 0)),      # FC bias, lane-padded f32
        ],
        out_specs=pl.BlockSpec((bt, C_PAD), lambda i: (i, 0)),
        compiler_params=pltpu.CompilerParams(
            dimension_semantics=("parallel",),               # shard batch tiles across TCs
            vmem_limit_bytes=32 * 1024 * 1024,
        ),
    )(fng_rh, params["wa"], params["ba"], params["cv"],
      params["wfc"], params["bfc"])
    return out[:B, :N_CLASSES]


# ----------------------------- parameters ------------------------------------
def init_params(key):
    # TODO(synk): real checkpoint weights unavailable; synthesized with
    # PyTorch-default-style init at the shapes the module implies.
    k1, k2, k3, k4, k5 = jax.random.split(key, 5)
    bound = 1.0 / (INPUT_SIZE ** 0.5)
    wa = jax.random.uniform(k1, (INPUT_SIZE, INPUT_SIZE), jnp.float32, -bound, bound)
    ba = jax.random.uniform(k2, (1, INPUT_SIZE), jnp.float32, -bound, bound)
    cv = jax.random.uniform(k3, (1, INPUT_SIZE), jnp.float32, -1.0, 1.0)  # uniform_(-1, 1)
    wfc = jax.random.uniform(k4, (INPUT_SIZE, N_CLASSES), jnp.float32, -bound, bound)
    bfc = jax.random.uniform(k5, (1, N_CLASSES), jnp.float32, -bound, bound)
    # lane-pad the FC output dim to 128 so the kernel's final store is lane-dense
    wfc_pad = jnp.zeros((INPUT_SIZE, C_PAD), jnp.float32).at[:, :N_CLASSES].set(wfc)
    bfc_pad = jnp.zeros((1, C_PAD), jnp.float32).at[:, :N_CLASSES].set(bfc)
    return {
        "wa": wa.astype(jnp.bfloat16),        # pre-cast once: MXU operand
        "ba": ba,
        "cv": cv,
        "wfc": wfc_pad.astype(jnp.bfloat16),  # pre-cast once: MXU operand
        "bfc": bfc_pad,
    }


# ----------------------------- pure-JAX reference ----------------------------
def reference_forward(params, x):
    wa = params["wa"].astype(jnp.float32)
    a = jnp.tanh(x @ wa + params["ba"][0])                      # (B, T, D)
    sim = jnp.sum(a * params["cv"][0], axis=-1)                 # (B, T)
    sim = jnp.where(jnp.sum(x, axis=-1) == 0.0, NEG_INF, sim)
    w = jax.nn.softmax(sim, axis=1)
    summary = jnp.maximum(jnp.sum(w[:, :, None] * x, axis=1), 0.0)
    wfc = params["wfc"].astype(jnp.float32)[:, :N_CLASSES]
    return summary @ wfc + params["bfc"][0, :N_CLASSES]


# ----------------------------- main -------------------------------------------
if __name__ == "__main__":
    key = jax.random.PRNGKey(0)
    pkey, xkey = jax.random.split(key)
    params = init_params(pkey)

    B, T = 2, 8
    x = jax.random.normal(xkey, (B, T, INPUT_SIZE), jnp.float32)
    rh_length = jnp.array([T, 5], jnp.int32)
    # zero out rows past each sequence length (the padding convention the
    # reference module's mask `x.sum(-1) == 0` relies on)
    tok = jnp.arange(T)[None, :, None]
    x = jnp.where(tok < rh_length[:, None, None], x, 0.0)

    out = jax.block_until_ready(attention_classifier_forward(params, x, rh_length))
    ref = jax.block_until_ready(reference_forward(params, x))

    assert out.shape == (B, N_CLASSES)
    assert bool(jnp.all(jnp.isfinite(out)))
    assert bool(jnp.allclose(out, ref, atol=5e-2, rtol=5e-2))
    print("KERNEL_OK")
</pallas_src>

<mosaic_0001>
module attributes {stable_mosaic.version = 11 : i64} {
  func.func @_attn_cls_kernel(%arg0: i32, %arg1: memref<8x8x10xf32, #tpu.memory_space<vmem>>, %arg2: memref<10x10xbf16, #tpu.memory_space<vmem>>, %arg3: memref<1x10xf32, #tpu.memory_space<vmem>>, %arg4: memref<1x10xf32, #tpu.memory_space<vmem>>, %arg5: memref<10x128xbf16, #tpu.memory_space<vmem>>, %arg6: memref<1x128xf32, #tpu.memory_space<vmem>>, %arg7: memref<8x128xf32, #tpu.memory_space<vmem>>) attributes {dimension_semantics = [#tpu.dimension_semantics<parallel>], iteration_bounds = array<i64: 1>, scalar_prefetch = 0 : i64, scratch_operands = 0 : i64, tpu.core_type = #tpu.core_type<tc>, window_params = [{transform_indices = @transform_0, window_bounds = array<i64: 8, 8, 10>}, {pipeline_mode = #tpu.pipeline_mode<synchronous>, transform_indices = @transform_1, window_bounds = array<i64: 10, 10>}, {pipeline_mode = #tpu.pipeline_mode<synchronous>, transform_indices = @transform_2, window_bounds = array<i64: 1, 10>}, {pipeline_mode = #tpu.pipeline_mode<synchronous>, transform_indices = @transform_3, window_bounds = array<i64: 1, 10>}, {pipeline_mode = #tpu.pipeline_mode<synchronous>, transform_indices = @transform_4, window_bounds = array<i64: 10, 128>}, {pipeline_mode = #tpu.pipeline_mode<synchronous>, transform_indices = @transform_5, window_bounds = array<i64: 1, 128>}, {transform_indices = @transform_6, window_bounds = array<i64: 8, 128>}]} {
    %c0 = arith.constant 0 : index
    %c0_0 = arith.constant 0 : index
    %c0_1 = arith.constant 0 : index
    %0 = vector.load %arg1[%c0, %c0_0, %c0_1] : memref<8x8x10xf32, #tpu.memory_space<vmem>>, vector<8x8x10xf32>
    %1 = vector.shape_cast %0 : vector<8x8x10xf32> to vector<64x10xf32>
    %2 = arith.truncf %1 : vector<64x10xf32> to vector<64x10xbf16>
    %c0_2 = arith.constant 0 : index
    %c0_3 = arith.constant 0 : index
    %3 = vector.load %arg2[%c0_2, %c0_3] : memref<10x10xbf16, #tpu.memory_space<vmem>>, vector<10x10xbf16>
    %cst = arith.constant dense<0.000000e+00> : vector<64x10xf32>
    %4 = tpu.matmul %2, %3, %cst {dimension_numbers = #tpu.dot_dimension_numbers<[1], [0], [0], [1], [0, 0, 1, 1], [], []>} : vector<64x10xbf16>, vector<10x10xbf16>, vector<64x10xf32> -> vector<64x10xf32>
    %c0_4 = arith.constant 0 : index
    %c0_5 = arith.constant 0 : index
    %5 = vector.load %arg3[%c0_4, %c0_5] : memref<1x10xf32, #tpu.memory_space<vmem>>, vector<1x10xf32>
    %6 = vector.broadcast %5 : vector<1x10xf32> to vector<64x10xf32>
    %7 = arith.addf %4, %6 : vector<64x10xf32>
    %8 = math.tanh %7 : vector<64x10xf32>
    %9 = vector.shape_cast %8 : vector<64x10xf32> to vector<8x8x10xf32>
    %c0_6 = arith.constant 0 : index
    %c0_7 = arith.constant 0 : index
    %10 = vector.load %arg4[%c0_6, %c0_7] : memref<1x10xf32, #tpu.memory_space<vmem>>, vector<1x10xf32>
    %11 = vector.shape_cast %10 : vector<1x10xf32> to vector<1x1x10xf32>
    %12 = vector.broadcast %11 : vector<1x1x10xf32> to vector<8x8x10xf32>
    %13 = arith.mulf %9, %12 : vector<8x8x10xf32>
    %cst_8 = arith.constant dense<0.000000e+00> : vector<8x8xf32>
    %14 = vector.multi_reduction <add>, %13, %cst_8 [2] : vector<8x8x10xf32> to vector<8x8xf32>
    %15 = vector.shape_cast %14 : vector<8x8xf32> to vector<8x8x1xf32>
    %cst_9 = arith.constant dense<0.000000e+00> : vector<8x8xf32>
    %16 = vector.multi_reduction <add>, %0, %cst_9 [2] : vector<8x8x10xf32> to vector<8x8xf32>
    %17 = vector.shape_cast %16 : vector<8x8xf32> to vector<8x8x1xf32>
    %cst_10 = arith.constant 0.000000e+00 : f32
    %18 = vector.broadcast %cst_10 : f32 to vector<8x8x1xf32>
    %19 = arith.cmpf oeq, %17, %18 : vector<8x8x1xf32>
    %cst_11 = arith.constant -1.000000e+10 : f32
    %20 = vector.broadcast %cst_11 : f32 to vector<8x8x1xf32>
    %21 = arith.select %19, %20, %15 : vector<8x8x1xi1>, vector<8x8x1xf32>
    %cst_12 = arith.constant dense<0xFF800000> : vector<8x1xf32>
    %22 = vector.multi_reduction <maximumf>, %21, %cst_12 [1] : vector<8x8x1xf32> to vector<8x1xf32>
    %23 = vector.shape_cast %22 : vector<8x1xf32> to vector<8x1x1xf32>
    %24 = vector.broadcast %23 : vector<8x1x1xf32> to vector<8x8x1xf32>
    %25 = arith.subf %21, %24 : vector<8x8x1xf32>
    %26 = math.exp %25 : vector<8x8x1xf32>
    %cst_13 = arith.constant dense<0.000000e+00> : vector<8x1xf32>
    %27 = vector.multi_reduction <add>, %26, %cst_13 [1] : vector<8x8x1xf32> to vector<8x1xf32>
    %28 = vector.shape_cast %27 : vector<8x1xf32> to vector<8x1x1xf32>
    %29 = tpu.reciprocal %28 : vector<8x1x1xf32> -> vector<8x1x1xf32>
    %30 = vector.broadcast %29 : vector<8x1x1xf32> to vector<8x8x1xf32>
    %31 = arith.mulf %26, %30 : vector<8x8x1xf32>
    %32 = vector.broadcast %31 : vector<8x8x1xf32> to vector<8x8x10xf32>
    %33 = arith.mulf %32, %0 : vector<8x8x10xf32>
    %cst_14 = arith.constant dense<0.000000e+00> : vector<8x10xf32>
    %34 = vector.multi_reduction <add>, %33, %cst_14 [1] : vector<8x8x10xf32> to vector<8x10xf32>
    %cst_15 = arith.constant 0.000000e+00 : f32
    %35 = vector.broadcast %cst_15 : f32 to vector<8x10xf32>
    %36 = arith.maximumf %34, %35 : vector<8x10xf32>
    %37 = arith.truncf %36 : vector<8x10xf32> to vector<8x10xbf16>
    %c0_16 = arith.constant 0 : index
    %c0_17 = arith.constant 0 : index
    %38 = vector.load %arg5[%c0_16, %c0_17] : memref<10x128xbf16, #tpu.memory_space<vmem>>, vector<10x128xbf16>
    %cst_18 = arith.constant dense<0.000000e+00> : vector<8x128xf32>
    %39 = tpu.matmul %37, %38, %cst_18 {dimension_numbers = #tpu.dot_dimension_numbers<[1], [0], [0], [1], [0, 0, 1, 1], [], []>} : vector<8x10xbf16>, vector<10x128xbf16>, vector<8x128xf32> -> vector<8x128xf32>
    %c0_19 = arith.constant 0 : index
    %c0_20 = arith.constant 0 : index
    %40 = vector.load %arg6[%c0_19, %c0_20] : memref<1x128xf32, #tpu.memory_space<vmem>>, vector<1x128xf32>
    %41 = vector.broadcast %40 : vector<1x128xf32> to vector<8x128xf32>
    %42 = arith.addf %39, %41 : vector<8x128xf32>
    %c0_21 = arith.constant 0 : index
    %c0_22 = arith.constant 0 : index
    %43 = vector.load %arg7[%c0_21, %c0_22] : memref<8x128xf32, #tpu.memory_space<vmem>>, vector<8x128xf32>
    tpu.vector_store %arg7[%c0_21, %c0_22], %42 {strides = array<i32>} : memref<8x128xf32, #tpu.memory_space<vmem>>, vector<8x128xf32>,
    return
  }
  func.func @transform_0(%arg0: i32) -> (i32, i32, i32) {
    %c0_i32 = arith.constant 0 : i32
    %c0_i32_0 = arith.constant 0 : i32
    %c0_i32_1 = arith.constant 0 : i32
    return %arg0, %c0_i32, %c0_i32_0 : i32, i32, i32
  }
  func.func @transform_1(%arg0: i32) -> (i32, i32) {
    %c0_i32 = arith.constant 0 : i32
    %c0_i32_0 = arith.constant 0 : i32
    %c0_i32_1 = arith.constant 0 : i32
    return %c0_i32, %c0_i32_0 : i32, i32
  }
  func.func @transform_2(%arg0: i32) -> (i32, i32) {
    %c0_i32 = arith.constant 0 : i32
    %c0_i32_0 = arith.constant 0 : i32
    %c0_i32_1 = arith.constant 0 : i32
    return %c0_i32, %c0_i32_0 : i32, i32
  }
  func.func @transform_3(%arg0: i32) -> (i32, i32) {
    %c0_i32 = arith.constant 0 : i32
    %c0_i32_0 = arith.constant 0 : i32
    %c0_i32_1 = arith.constant 0 : i32
    return %c0_i32, %c0_i32_0 : i32, i32
  }
  func.func @transform_4(%arg0: i32) -> (i32, i32) {
    %c0_i32 = arith.constant 0 : i32
    %c0_i32_0 = arith.constant 0 : i32
    %c0_i32_1 = arith.constant 0 : i32
    return %c0_i32, %c0_i32_0 : i32, i32
  }
  func.func @transform_5(%arg0: i32) -> (i32, i32) {
    %c0_i32 = arith.constant 0 : i32
    %c0_i32_0 = arith.constant 0 : i32
    %c0_i32_1 = arith.constant 0 : i32
    return %c0_i32, %c0_i32_0 : i32, i32
  }
  func.func @transform_6(%arg0: i32) -> (i32, i32) {
    %c0_i32 = arith.constant 0 : i32
    %c0_i32_0 = arith.constant 0 : i32
    return %arg0, %c0_i32 : i32, i32
  }
}

</mosaic_0001>

<bundles_post_ra>
// kernel: attention_classifier_forward.1
= control target key start
LH: loop header
LB: loop body
LE: loop exit
PB: predicated region body
PF: predicated region fallthrough
CT: control target
= control target key end

     0   :  { %vm63_vm0 = vcmask 1044480   ;;  %vm50_vm1 = vcmask 80896   ;;  %vm618_vm2 = vmmov 0   ;;  %vm460_vm11 = vcmask 1041409   ;;  %s808_s1 = inlined_call_operand.vmem [shape: bf16[10,10], index: 1, kind: input, shape index: {}]   ;;  %s809_s0 = inlined_call_operand.vmem [shape: f32[8,8,10], index: 0, kind: input, shape index: {}]   ;;  %s810_s2 = inlined_call_operand.vmem [shape: f32[1,10], index: 2, kind: input, shape index: {}]   ;;  %s811_s3 = inlined_call_operand.vmem [shape: f32[1,10], index: 3, kind: input, shape index: {}]   ;;  %s812_s4 = inlined_call_operand.vmem [shape: bf16[10,128], index: 4, kind: input, shape index: {}]   ;;  %s813_s5 = inlined_call_operand.vmem [shape: f32[1,128], index: 5, kind: input, shape index: {}]   ;;  %s814_s6 = inlined_call_operand.vmem [shape: f32[8,128], index: 6, kind: output, shape index: {}]  }
   0x1   :  { %v567_v0 = vld [vmem:[%s808_s1] sm:$0x1f]   ;;  %v665_v2 = vld [vmem:[%s809_s0 + $0x8] sm:$0xff]  ;;  %v670_v3 = vld [vmem:[%s809_s0 + $0x10] sm:$0xff]  ;;  %vm462_vm12 = vcmask 1042434   ;;  %vm464_vm13 = vcmask 1043459  }
   0x2   :  { %v660_v1 = vld [vmem:[%s809_s0] sm:$0xff]  ;;  %564 = vmatprep.subr.msk.bf16.mxu0 %vm63_vm0, %v567_v0  ;;  %v65_v4 = vsel %vm63_vm0, %v567_v0, 0  ;;  %v679_v6 = vld [vmem:[%s809_s0 + $0x18] sm:$0xff]  ;;  %v689_v8 = vld [vmem:[%s809_s0 + $0x28] sm:$0xff]  ;;  %v182_v15 = vsel %vm50_vm1, %v665_v2, 0.0  ;;  %v185_v16 = vsel %vm50_vm1, %v670_v3, 0.0 }
   0x3   :  { %v32_v5 = vpack.c.bf16 %v665_v2, %v660_v1  ;;  %v684_v7 = vld [vmem:[%s809_s0 + $0x20] sm:$0xff]  ;;  %549 = vmatpush3.bf16.msra.mxu0 %v65_v4  ;;  %v33_v9 = vpack.c.bf16 %v679_v6, %v670_v3  ;;  %v701_v11 = vld [vmem:[%s809_s0 + $0x30] sm:$0xff]  ;;  %v706_v12 = vld [vmem:[%s809_s0 + $0x38] sm:$0xff]  ;;  %v179_v14 = vsel %vm50_vm1, %v660_v1, 0.0  ;;  %v188_v17 = vsel %vm50_vm1, %v679_v6, 0.0 }
   0x4   :  { %v34_v10 = vpack.c.bf16 %v689_v8, %v684_v7  ;;  %v35_v13 = vpack.c.bf16 %v706_v12, %v701_v11  ;;  %180 = vadd.xlane.f32.xlu0 %v179_v14  ;;  %v191_v18 = vsel %vm50_vm1, %v684_v7, 0.0  ;;  %v194_v19 = vsel %vm50_vm1, %v689_v8, 0.0  ;;  %v531_v22 = vld [vmem:[%s810_s2] ss:$0 sm:$0xff] }
   0x5   :  { %550 = vmatprep.mubr.msk.bf16.mxu0 %vm50_vm1, %v32_v5  ;;  %v197_v20 = vsel %vm50_vm1, %v701_v11, 0.0  ;;  %v200_v21 = vsel %vm50_vm1, %v706_v12, 0.0  ;;  %v537_v36 = vld [vmem:[%s811_s3] ss:$0 sm:$0xff]  ;;  %v617_v0 = vmov 0.0   ;;  %vm466_vm14 = vcmask 1044484  }
   0x6   :  { %551 = vmatmul.mubr.msk.bf16.vlgmr.msra.gmra.mrb[0].mxu0 %vm50_vm1, %v33_v9  ;;  %558 = vmatprep.subr.bf16.mxu1 %v617_v0  ;;  %v568_v4 = vld [vmem:[%s812_s4] sm:$0x1f]   ;;  %vm468_vm15 = vcmask 1045509  }
   0x7   :  { %554 = vmatprep.mubr.msk.bf16.mxu0 %vm50_vm1, %v34_v10  ;;  %560 = vmatprep.mubr.msk.bf16.mxu1 %vm618_vm2, %v617_v0  ;;  %v484_v5 = vsel %vm63_vm0, %v568_v4, 0  ;;  %vm470_vm0 = vcmask 1046534   ;;  %vm472_vm2 = vcmask 1047559  }
   0x8   :  { %183 = vadd.xlane.f32.xlu0 %v182_v15  ;;  %559 = vmatpush3.bf16.msra.mxu1 %v484_v5 }
   0xc   :  { %186 = vadd.xlane.f32.xlu0 %v185_v16 }
   0xe   :  { %555 = vmatmul.mubr.msk.bf16.gmra.mrb[4].mxu0 %vm50_vm1, %v35_v13 }
  0x10   :  { %189 = vadd.xlane.f32.xlu0 %v188_v17 }
  0x14   :  { %192 = vadd.xlane.f32.xlu0 %v191_v18 }
  0x18   :  { %195 = vadd.xlane.f32.xlu0 %v194_v19 }
  0x1c   :  { %198 = vadd.xlane.f32.xlu0 %v197_v20 }
  0x20   :  { %201 = vadd.xlane.f32.xlu0 %v200_v21 }
  0x91   :  { %v181_v9 = vpop.xlane.xlu0 %180 }
  0x92   :  { %vm203_vm4 = vcmp.eq.f32.partialorder %v181_v9, 0.0 }
  0x95   :  { %v184_v10 = vpop.xlane.xlu0 %183 }
  0x96   :  { %vm204_vm6 = vcmp.eq.f32.partialorder %v184_v10, 0.0 }
  0x99   :  { %v187_v13 = vpop.xlane.xlu0 %186 }
  0x9a   :  { %vm205_vm3 = vcmp.eq.f32.partialorder %v187_v13, 0.0 }
  0x9d   :  { %v190_v14 = vpop.xlane.xlu0 %189 }
  0x9e   :  { %vm206_vm5 = vcmp.eq.f32.partialorder %v190_v14, 0.0 }
  0xa1   :  { %v193_v15 = vpop.xlane.xlu0 %192 }
  0xa2   :  { %vm207_vm8 = vcmp.eq.f32.partialorder %v193_v15, 0.0 }
  0xa5   :  { %v196_v21 = vpop.xlane.xlu0 %195 }
  0xa6   :  { %vm208_vm9 = vcmp.eq.f32.partialorder %v196_v21, 0.0 }
  0xd9   :  { %v552_v23 = vpop.f32.mrb[0].mxu0 }
  0xda   :  { %v110_v24 = vadd.f32 %v552_v23, %v531_v22  ;;  %v101_v25 = vpop.f32.mrb[1].mxu0 }
  0xdb   :  { %v102_v26 = vadd.f32 %v531_v22, %v101_v25  ;;  %v553_v27 = vpop.f32.mrb[2].mxu0 }
  0xdc   :  { %569 = vtanh.f32 %v110_v24  ;;  %v113_v28 = vadd.f32 %v553_v27, %v531_v22  ;;  %v104_v29 = vpop.f32.mrb[3].mxu0 }
  0xdd   :  { %571 = vtanh.f32 %v102_v26  ;;  %v105_v30 = vadd.f32 %v531_v22, %v104_v29 }
  0xde   :  { %573 = vtanh.f32 %v113_v28 }
  0xdf   :  { %575 = vtanh.f32 %v105_v30 }
  0xe1   :  { %v556_v31 = vpop.f32.mrb[4].mxu0 }
  0xe2   :  { %v126_v32 = vadd.f32 %v556_v31, %v531_v22  ;;  %v117_v33 = vpop.f32.mrb[5].mxu0 }
  0xe3   :  { %v557_v34 = vpop.f32.mrb[6].mxu0  ;;  %v118_v40 = vadd.f32 %v531_v22, %v117_v33 }
  0xe4   :  { %v120_v35 = vpop.f32.mrb[7].mxu0  ;;  %577 = vtanh.f32 %v126_v32  ;;  %v129_v49 = vadd.f32 %v557_v34, %v531_v22  ;;  %v199_v32 = vpop.xlane.xlu0 %198 }
  0xe5   :  { %579 = vtanh.f32 %v118_v40  ;;  %v121_v44 = vadd.f32 %v531_v22, %v120_v35  ;;  %vm209_vm7 = vcmp.eq.f32.partialorder %v199_v32, 0.0 }
  0xe6   :  { %v570_v37 = vpop.eup %569 }
  0xe7   :  { %v572_v38 = vpop.eup %571  ;;  %v149_v39 = vmul.f32 %v570_v37, %v537_v36  ;;  %581 = vtanh.f32 %v121_v44 }
  0xe8   :  { %v147_v42 = vmul.f32 %v572_v38, %v537_v36  ;;  %v574_v43 = vpop.eup %573  ;;  %583 = vtanh.f32 %v129_v49 }
  0xe9   :  { %v161_v41 = vsel %vm50_vm1, %v149_v39, 0.0  ;;  %v150_v46 = vmul.f32 %v574_v43, %v537_v36  ;;  %v576_v47 = vpop.eup %575 }
  0xea   :  { %162 = vadd.xlane.f32.xlu1 %v161_v41  ;;  %v155_v45 = vsel %vm50_vm1, %v147_v42, 0.0  ;;  %v148_v51 = vmul.f32 %v576_v47, %v537_v36 }
  0xeb   :  { %v164_v50 = vsel %vm50_vm1, %v150_v46, 0.0 }
  0xec   :  { %v158_v53 = vsel %vm50_vm1, %v148_v51, 0.0 }
  0xee   :  { %156 = vadd.xlane.f32.xlu1 %v155_v45  ;;  %v578_v48 = vpop.eup %577 }
  0xef   :  { %v153_v52 = vmul.f32 %v578_v48, %v537_v36  ;;  %v580_v54 = vpop.eup %579 }
  0xf0   :  { %v151_v56 = vmul.f32 %v580_v54, %v537_v36 }
  0xf1   :  { %v173_v55 = vsel %vm50_vm1, %v153_v52, 0.0  ;;  %v582_v57 = vpop.eup %581 }
  0xf2   :  { %165 = vadd.xlane.f32.xlu1 %v164_v50  ;;  %v167_v58 = vsel %vm50_vm1, %v151_v56, 0.0  ;;  %v152_v59 = vmul.f32 %v582_v57, %v537_v36  ;;  %v584_v60 = vpop.eup %583 }
  0xf3   :  { %v154_v62 = vmul.f32 %v584_v60, %v537_v36 }
  0xf4   :  { %v170_v61 = vsel %vm50_vm1, %v152_v59, 0.0 }
  0xf5   :  { %v176_v63 = vsel %vm50_vm1, %v154_v62, 0.0 }
  0xf6   :  { %159 = vadd.xlane.f32.xlu1 %v158_v53 }
  0xfa   :  { %174 = vadd.xlane.f32.xlu1 %v173_v55 }
  0xfe   :  { %168 = vadd.xlane.f32.xlu1 %v167_v58 }
 0x102   :  { %171 = vadd.xlane.f32.xlu1 %v170_v61  ;;  %v202_v61 = vpop.xlane.xlu0 %201 }
 0x103   :  { %vm210_vm10 = vcmp.eq.f32.partialorder %v202_v61, 0.0 }
 0x106   :  { %177 = vadd.xlane.f32.xlu1 %v176_v63 }
 0x177   :  { %v163_v16 = vpop.xlane.xlu1 %162 }
 0x178   :  { %v213_v17 = vsel %vm205_vm3, -1e+10, %v163_v16 }
 0x179   :  { %v231_v18 = vrot.slane %v213_v17, 4 }
 0x17b   :  { %v232_v19 = vmax.f32 %v213_v17, %v231_v18  ;;  %v157_v20 = vpop.xlane.xlu1 %156 }
 0x17c   :  { %v211_v22 = vsel %vm203_vm4, -1e+10, %v157_v20 }
 0x17d   :  { %v233_v23 = vrot.slane %v232_v19, 2  ;;  %v219_v24 = vrot.slane %v211_v22, 4 }
 0x17f   :  { %v234_v25 = vmax.f32 %v232_v19, %v233_v23  ;;  %v220_v26 = vmax.f32 %v211_v22, %v219_v24  ;;  %v166_v27 = vpop.xlane.xlu1 %165 }
 0x180   :  { %v214_v28 = vsel %vm206_vm5, -1e+10, %v166_v27 }
 0x181   :  { %v235_v29 = vrot.slane %v234_v25, 1  ;;  %v221_v30 = vrot.slane %v220_v26, 2  ;;  %v237_v31 = vrot.slane %v214_v28, 4 }
 0x183   :  { %v236_v33 = vmax.f32 %v234_v25, %v235_v29  ;;  %v222_v34 = vmax.f32 %v220_v26, %v221_v30  ;;  %v238_v35 = vmax.f32 %v214_v28, %v237_v31  ;;  %v160_v36 = vpop.xlane.xlu1 %159 }
 0x184   :  { %v212_v37 = vsel %vm204_vm6, -1e+10, %v160_v36 }
 0x185   :  { %v269_v38 = vsub.f32 %v213_v17, %v236_v33  ;;  %v223_v39 = vrot.slane %v222_v34, 1  ;;  %v239_v40 = vrot.slane %v238_v35, 2  ;;  %v225_v41 = vrot.slane %v212_v37, 4 }
 0x187   :  { %v279_v42 = vmul.f32 1.442695, %v269_v38  ;;  %v224_v43 = vmax.f32 %v222_v34, %v223_v39  ;;  %v240_v44 = vmax.f32 %v238_v35, %v239_v40  ;;  %v226_v45 = vmax.f32 %v212_v37, %v225_v41  ;;  %v175_v46 = vpop.xlane.xlu1 %174 }
 0x188   :  { %v217_v47 = vsel %vm209_vm7, -1e+10, %v175_v46 }
 0x189   :  { %585 = vpow2.f32 %v279_v42  ;;  %v267_v48 = vsub.f32 %v211_v22, %v224_v43  ;;  %v241_v49 = vrot.slane %v240_v44, 1  ;;  %v227_v50 = vrot.slane %v226_v45, 2 }
 0x18a   :  { %v255_v51 = vrot.slane %v217_v47, 4 }
 0x18b   :  { %v275_v52 = vmul.f32 1.442695, %v267_v48  ;;  %v242_v53 = vmax.f32 %v240_v44, %v241_v49  ;;  %v228_v54 = vmax.f32 %v226_v45, %v227_v50  ;;  %v169_v55 = vpop.xlane.xlu1 %168 }
 0x18c   :  { %v256_v56 = vmax.f32 %v217_v47, %v255_v51  ;;  %v215_v57 = vsel %vm207_vm8, -1e+10, %v169_v55 }
 0x18d   :  { %587 = vpow2.f32 %v275_v52  ;;  %v270_v58 = vsub.f32 %v214_v28, %v242_v53  ;;  %v229_v59 = vrot.slane %v228_v54, 1  ;;  %v243_v60 = vrot.slane %v215_v57, 4 }
 0x18e   :  { %v257_v62 = vrot.slane %v256_v56, 2 }
 0x18f   :  { %v281_v63 = vmul.f32 1.442695, %v270_v58  ;;  %v230_v0 = vmax.f32 %v228_v54, %v229_v59  ;;  %v244_v4 = vmax.f32 %v215_v57, %v243_v60  ;;  %v172_v5 = vpop.xlane.xlu1 %171 }
 0x190   :  { %v258_v9 = vmax.f32 %v256_v56, %v257_v62  ;;  %v216_v10 = vsel %vm208_vm9, -1e+10, %v172_v5 }
 0x191   :  { %589 = vpow2.f32 %v281_v63  ;;  %v268_v13 = vsub.f32 %v212_v37, %v230_v0  ;;  %v245_v14 = vrot.slane %v244_v4, 2  ;;  %v249_v15 = vrot.slane %v216_v10, 4 }
 0x192   :  { %v259_v16 = vrot.slane %v258_v9, 1 }
 0x193   :  { %v745_v17 = vpop.eup %585  ;;  %v277_v18 = vmul.f32 1.442695, %v268_v13  ;;  %v246_v19 = vmax.f32 %v244_v4, %v245_v14  ;;  %v250_v20 = vmax.f32 %v216_v10, %v249_v15  ;;  %v178_v22 = vpop.xlane.xlu1 %177 }
 0x194   :  { %v303_v23 = vrot.slane %v745_v17, 4  ;;  %v260_v21 = vmax.f32 %v258_v9, %v259_v16  ;;  %v218_v24 = vsel %vm210_vm10, -1e+10, %v178_v22 }
 0x195   :  { %591 = vpow2.f32 %v277_v18  ;;  %v247_v25 = vrot.slane %v246_v19, 1  ;;  %v251_v26 = vrot.slane %v250_v20, 2  ;;  %v261_v27 = vrot.slane %v218_v24, 4 }
 0x196   :  { %v304_v28 = vadd.f32 %v745_v17, %v303_v23  ;;  %v273_v29 = vsub.f32 %v217_v47, %v260_v21 }
 0x197   :  { %v749_v30 = vpop.eup %587  ;;  %v248_v31 = vmax.f32 %v246_v19, %v247_v25  ;;  %v252_v32 = vmax.f32 %v250_v20, %v251_v26  ;;  %v262_v33 = vmax.f32 %v218_v24, %v261_v27 }
 0x198   :  { %v305_v34 = vrot.slane %v304_v28, 2  ;;  %v291_v35 = vrot.slane %v749_v30, 4  ;;  %v287_v36 = vmul.f32 1.442695, %v273_v29 }
 0x199   :  { %v271_v37 = vsub.f32 %v215_v57, %v248_v31  ;;  %v253_v38 = vrot.slane %v252_v32, 1  ;;  %v263_v39 = vrot.slane %v262_v33, 2 }
 0x19a   :  { %v306_v40 = vadd.f32 %v305_v34, %v304_v28  ;;  %v292_v41 = vadd.f32 %v749_v30, %v291_v35  ;;  %593 = vpow2.f32 %v287_v36 }
 0x19b   :  { %v753_v42 = vpop.eup %589  ;;  %v283_v43 = vmul.f32 1.442695, %v271_v37  ;;  %v254_v44 = vmax.f32 %v252_v32, %v253_v38  ;;  %v264_v45 = vmax.f32 %v262_v33, %v263_v39 }
 0x19c   :  { %v307_v46 = vrot.slane %v306_v40, 1  ;;  %v293_v47 = vrot.slane %v292_v41, 2  ;;  %v309_v48 = vrot.slane %v753_v42, 4 }
 0x19d   :  { %595 = vpow2.f32 %v283_v43  ;;  %v272_v49 = vsub.f32 %v216_v10, %v254_v44  ;;  %v265_v50 = vrot.slane %v264_v45, 1 }
 0x19e   :  { %v308_v51 = vadd.f32 %v307_v46, %v306_v40  ;;  %v294_v52 = vadd.f32 %v293_v47, %v292_v41  ;;  %v310_v53 = vadd.f32 %v753_v42, %v309_v48 }
 0x19f   :  { %v757_v54 = vpop.eup %591  ;;  %v285_v55 = vmul.f32 1.442695, %v272_v49  ;;  %v266_v56 = vmax.f32 %v264_v45, %v265_v50 }
 0x1a0   :  { %597 = vrcp.f32 %v308_v51  ;;  %v295_v57 = vrot.slane %v294_v52, 1  ;;  %v311_v58 = vrot.slane %v310_v53, 2  ;;  %v297_v59 = vrot.slane %v757_v54, 4 }
 0x1a1   :  { %599 = vpow2.f32 %v285_v55  ;;  %v274_v60 = vsub.f32 %v218_v24, %v266_v56 }
 0x1a2   :  { %v296_v61 = vadd.f32 %v295_v57, %v294_v52  ;;  %v312_v62 = vadd.f32 %v311_v58, %v310_v53  ;;  %v298_v63 = vadd.f32 %v757_v54, %v297_v59 }
 0x1a3   :  { %v289_v0 = vmul.f32 1.442695, %v274_v60 }
 0x1a4   :  { %v761_v4 = vpop.eup %593  ;;  %601 = vrcp.f32 %v296_v61  ;;  %v313_v5 = vrot.slane %v312_v62, 1  ;;  %v299_v9 = vrot.slane %v298_v63, 2 }
 0x1a5   :  { %v327_v10 = vrot.slane %v761_v4, 4  ;;  %603 = vpow2.f32 %v289_v0 }
 0x1a6   :  { %v314_v13 = vadd.f32 %v313_v5, %v312_v62  ;;  %v300_v14 = vadd.f32 %v299_v9, %v298_v63 }
 0x1a7   :  { %v764_v15 = vpop.eup %595  ;;  %v328_v16 = vadd.f32 %v761_v4, %v327_v10 }
 0x1a8   :  { %605 = vrcp.f32 %v314_v13  ;;  %v301_v18 = vrot.slane %v300_v14, 1  ;;  %v315_v19 = vrot.slane %v764_v15, 4 }
 0x1a9   :  { %v329_v20 = vrot.slane %v328_v16, 2 }
 0x1aa   :  { %v598_v22 = vpop.eup %597  ;;  %v302_v23 = vadd.f32 %v301_v18, %v300_v14  ;;  %v316_v21 = vadd.f32 %v764_v15, %v315_v19 }
 0x1ab   :  { %v769_v24 = vpop.eup %599  ;;  %v349_v25 = vmul.f32 %v598_v22, %v745_v17  ;;  %v330_v26 = vadd.f32 %v329_v20, %v328_v16 }
 0x1ac   :  { %607 = vrcp.f32 %v302_v23  ;;  %v317_v27 = vrot.slane %v316_v21, 2  ;;  %v321_v28 = vrot.slane %v769_v24, 4 }
 0x1ad   :  { %v357_v29 = vmul.f32 %v349_v25, %v670_v3  ;;  %v331_v31 = vrot.slane %v330_v26, 1 }
 0x1ae   :  { %v602_v32 = vpop.eup %601  ;;  %v318_v33 = vadd.f32 %v317_v27, %v316_v21  ;;  %v322_v34 = vadd.f32 %v769_v24, %v321_v28 }
 0x1af   :  { %v775_v35 = vpop.eup %603  ;;  %v347_v36 = vmul.f32 %v602_v32, %v749_v30  ;;  %v332_v37 = vadd.f32 %v331_v31, %v330_v26  ;;  %v377_v40 = vsel %vm50_vm1, %v357_v29, 0.0 }
 0x1b0   :  { %v319_v38 = vrot.slane %v318_v33, 1  ;;  %v323_v39 = vrot.slane %v322_v34, 2  ;;  %v333_v17 = vrot.slane %v775_v35, 4  ;;  %v378_v30 = vrot.slane %v377_v40, 4 }
 0x1b1   :  { %v355_v41 = vmul.f32 %v347_v36, %v660_v1  ;;  %609 = vrcp.f32 %v332_v37 }
 0x1b2   :  { %v606_v3 = vpop.eup %605  ;;  %v320_v43 = vadd.f32 %v319_v38, %v318_v33  ;;  %v324_v44 = vadd.f32 %v323_v39, %v322_v34  ;;  %v334_v45 = vadd.f32 %v775_v35, %v333_v17  ;;  %v379_v57 = vadd.f32 %v378_v30, %v377_v40 }
 0x1b3   :  { %v350_v46 = vmul.f32 %v606_v3, %v753_v42  ;;  %v363_v47 = vsel %vm50_vm1, %v355_v41, 0.0 }
 0x1b4   :  { %611 = vrcp.f32 %v320_v43  ;;  %v325_v48 = vrot.slane %v324_v44, 1  ;;  %v335_v49 = vrot.slane %v334_v45, 2  ;;  %v364_v50 = vrot.slane %v363_v47, 4 }
 0x1b5   :  { %v358_v51 = vmul.f32 %v350_v46, %v679_v6  ;;  %v380_v5 = vrot.slane %v379_v57, 2 }
 0x1b6   :  { %v608_v52 = vpop.eup %607  ;;  %v326_v53 = vadd.f32 %v325_v48, %v324_v44  ;;  %v336_v1 = vadd.f32 %v335_v49, %v334_v45  ;;  %v365_v55 = vadd.f32 %v364_v50, %v363_v47 }
 0x1b7   :  { %v348_v56 = vmul.f32 %v608_v52, %v757_v54  ;;  %v384_v58 = vsel %vm50_vm1, %v358_v51, 0.0  ;;  %v381_v20 = vadd.f32 %v380_v5, %v379_v57 }
 0x1b8   :  { %613 = vrcp.f32 %v326_v53  ;;  %v337_v42 = vrot.slane %v336_v1, 1  ;;  %v366_v59 = vrot.slane %v365_v55, 2  ;;  %v385_v60 = vrot.slane %v384_v58, 4 }
 0x1b9   :  { %v356_v61 = vmul.f32 %v348_v56, %v665_v2  ;;  %v382_v29 = vrot.slane %v381_v20, 1 }
 0x1ba   :  { %v338_v62 = vadd.f32 %v337_v42, %v336_v1  ;;  %v386_v63 = vadd.f32 %v385_v60, %v384_v58  ;;  %v367_v10 = vadd.f32 %v366_v59, %v365_v55 }
 0x1bb   :  { %v610_v0 = vpop.eup %609  ;;  %v370_v6 = vsel %vm50_vm1, %v356_v61, 0.0  ;;  %v383_v40 = vadd.f32 %v382_v29, %v381_v20 }
 0x1bc   :  { %615 = vrcp.f32 %v338_v62  ;;  %v353_v9 = vmul.f32 %v610_v0, %v761_v4  ;;  %v371_v54 = vrot.slane %v370_v6, 4  ;;  %v387_v13 = vrot.slane %v386_v63, 2 }
 0x1bd   :  { %v368_v2 = vrot.slane %v367_v10, 1  ;;  %v421_v51 = vmax.f32 %v383_v40, 0.0 }
 0x1be   :  { %v612_v14 = vpop.eup %611  ;;  %v361_v16 = vmul.f32 %v353_v9, %v701_v11  ;;  %v372_v18 = vadd.f32 %v371_v54, %v370_v6  ;;  %v388_v25 = vadd.f32 %v387_v13, %v386_v63 }
 0x1bf   :  { %v351_v19 = vmul.f32 %v612_v14, %v764_v15  ;;  %v369_v32 = vadd.f32 %v368_v2, %v367_v10  ;;  %v429_v60 = vpack.c.bf16 %v421_v51, %v421_v51 }
 0x1c0   :  { %v373_v22 = vrot.slane %v372_v18, 2  ;;  %v405_v23 = vsel %vm50_vm1, %v361_v16, 0.0  ;;  %v389_v36 = vrot.slane %v388_v25, 1 }
 0x1c1   :  { %v359_v21 = vmul.f32 %v351_v19, %v684_v7  ;;  %v406_v26 = vrot.slane %v405_v23, 4  ;;  %v419_v44 = vmax.f32 %v369_v32, 0.0  ;;  %v454_v13 = vunpack.c.l.b16 %v429_v60 }
 0x1c2   :  { %v614_v27 = vpop.eup %613  ;;  %v374_v4 = vadd.f32 %v373_v22, %v372_v18  ;;  %v390_v47 = vadd.f32 %v389_v36, %v388_v25 }
 0x1c3   :  { %v352_v28 = vmul.f32 %v614_v27, %v769_v24  ;;  %v391_v31 = vsel %vm50_vm1, %v359_v21, 0.0  ;;  %v407_v11 = vadd.f32 %v406_v26, %v405_v23  ;;  %v427_v1 = vpack.c.bf16 %v419_v44, %v419_v44 }
 0x1c4   :  { %v375_v33 = vrot.slane %v374_v4, 1  ;;  %v392_v15 = vrot.slane %v391_v31, 4  ;;  %v422_v55 = vmax.f32 %v390_v47, 0.0 }
 0x1c5   :  { %v360_v34 = vmul.f32 %v352_v28, %v689_v8  ;;  %v408_v37 = vrot.slane %v407_v11, 2  ;;  %v452_v63 = vunpack.c.l.b16 %v427_v1 }
 0x1c6   :  { %v616_v38 = vpop.eup %615  ;;  %v376_v39 = vadd.f32 %v375_v33, %v374_v4  ;;  %v393_v7 = vadd.f32 %v392_v15, %v391_v31  ;;  %v430_v0 = vpack.c.bf16 %v422_v55, %v422_v55  ;;  %v538_v15 = vld [vmem:[%s813_s5] ss:$0 sm:$0xff] }
 0x1c7   :  { %v354_v17 = vmul.f32 %v616_v38, %v775_v35  ;;  %v398_v41 = vsel %vm50_vm1, %v360_v34, 0.0  ;;  %v409_v24 = vadd.f32 %v408_v37, %v407_v11 }
 0x1c8   :  { %v394_v3 = vrot.slane %v393_v7, 2  ;;  %v399_v43 = vrot.slane %v398_v41, 4  ;;  %v420_v45 = vmax.f32 %v376_v39, 0.0  ;;  %v455_v22 = vunpack.c.l.b16 %v430_v0 }
 0x1c9   :  { %v362_v46 = vmul.f32 %v354_v17, %v706_v12  ;;  %v410_v49 = vrot.slane %v409_v24, 1 }
 0x1ca   :  { %v395_v30 = vadd.f32 %v394_v3, %v393_v7  ;;  %v400_v8 = vadd.f32 %v399_v43, %v398_v41  ;;  %v428_v48 = vpack.c.bf16 %v420_v45, %v420_v45 }
 0x1cb   :  { %v412_v50 = vsel %vm50_vm1, %v362_v46, 0.0  ;;  %v411_v59 = vadd.f32 %v410_v49, %v409_v24 }
 0x1cc   :  { %v396_v52 = vrot.slane %v395_v30, 1  ;;  %v401_v35 = vrot.slane %v400_v8, 2  ;;  %v413_v53 = vrot.slane %v412_v50, 4  ;;  %v453_v42 = vunpack.c.l.b16 %v428_v48 }
 0x1cd   :  { %v425_v54 = vmax.f32 %v411_v59, 0.0 }
 0x1ce   :  { %v397_v56 = vadd.f32 %v396_v52, %v395_v30  ;;  %v402_v57 = vadd.f32 %v401_v35, %v400_v8  ;;  %v414_v58 = vadd.f32 %v413_v53, %v412_v50  ;;  %v461_v10 = vsel %vm460_vm11, %v453_v42, %v452_v63 }
 0x1cf   :  { %v463_v19 = vsel %vm462_vm12, %v454_v13, %v461_v10  ;;  %v433_v23 = vpack.c.bf16 %v425_v54, %v425_v54 }
 0x1d0   :  { %v403_v12 = vrot.slane %v402_v57, 1  ;;  %v415_v61 = vrot.slane %v414_v58, 2  ;;  %v423_v62 = vmax.f32 %v397_v56, 0.0  ;;  %v465_v26 = vsel %vm464_vm13, %v455_v22, %v463_v19 }
 0x1d1   :  { %v458_v29 = vunpack.c.l.b16 %v433_v23 }
 0x1d2   :  { %v404_v6 = vadd.f32 %v403_v12, %v402_v57  ;;  %v416_v5 = vadd.f32 %v415_v61, %v414_v58  ;;  %v431_v9 = vpack.c.bf16 %v423_v62, %v423_v62 }
 0x1d4   :  { %v417_v14 = vrot.slane %v416_v5, 1  ;;  %v424_v16 = vmax.f32 %v404_v6, 0.0  ;;  %v456_v18 = vunpack.c.l.b16 %v431_v9 }
 0x1d6   :  { %v418_v20 = vadd.f32 %v417_v14, %v416_v5  ;;  %v432_v2 = vpack.c.bf16 %v424_v16, %v424_v16  ;;  %v467_v27 = vsel %vm466_vm14, %v456_v18, %v465_v26 }
 0x1d8   :  { %v426_v21 = vmax.f32 %v418_v20, 0.0  ;;  %v457_v25 = vunpack.c.l.b16 %v432_v2 }
 0x1da   :  { %v434_v4 = vpack.c.bf16 %v426_v21, %v426_v21  ;;  %v469_v28 = vsel %vm468_vm15, %v457_v25, %v467_v27 }
 0x1db   :  { %v471_v11 = vsel %vm470_vm0, %v458_v29, %v469_v28 }
 0x1dc   :  { %v459_v31 = vunpack.c.l.b16 %v434_v4 }
 0x1de   :  { %v473_v32 = vsel %vm472_vm2, %v459_v31, %v471_v11 }
 0x1df   :  { %v474_v33 = vpack.c.b16 %v473_v32, %v473_v32 }
 0x1e1   :  { %561 = vmatmul.mubr.msk.bf16.vlgmr.msra.gmra.mrb[0].mxu1 %vm50_vm1, %v474_v33 }
 0x2b4   :  { %v520_v34 = vpop.f32.mrb[0].mxu1 }
 0x2b5   :  { %v521_v36 = vadd.f32 %v538_v15, %v520_v34  ;;  %v562_v37 = vpop.f32.mrb[1].mxu1 }
 0x2b6   :  { %v523_v38 = vpop.f32.mrb[2].mxu1 }
 0x2b7   :  { %526 = vst [vmem:[%s814_s6] sm:$0xff] %v521_v36  ;;  %v563_v39 = vpop.f32.mrb[3].mxu1 }

</bundles_post_ra>
